<compile_context>
chip_gen: v6e
topology: v6e:2x2x1
jax: 0.10.0
libtpu: 0.0.40
codegen_flags: <defaults>
</compile_context>

<pallas_src>
import functools

import jax
import jax.numpy as jnp
from jax.experimental import pallas as pl
from jax.experimental.pallas import tpu as pltpu

_LANE = 128                       # lane width (last-dim granularity)
_SUBLANE = 16                     # safe row granularity for f32 (8) and bf16 (16)
_MAX_TILE_B = 1024                # big M tiles amortize ~0.35us/step overhead
_VMEM_SOFT_BUDGET = 36 * 1024 * 1024   # per-step target, fits all of v5e/v6e/v7x
_VMEM_LIMIT_CAP = 48 * 1024 * 1024     # never exceed (v7x physical VMEM = 64 MiB)


def _round_up(n, m):
    return ((n + m - 1) // m) * m


def mlp_kernel(x_ref, w1_ref, b1_ref, w2_ref, b2_ref, o_ref, *, compute_dtype):
    # Cast x in-kernel (VPU work hides under MXU/DMA); avoids a separate
    # wrapper-side HBM read+write cast pass when the caller holds f32 x.
    x = x_ref[...].astype(compute_dtype)
    # First linear on the MXU with f32 accumulation; bias + ReLU in f32.
    h = jnp.dot(x, w1_ref[...], preferred_element_type=jnp.float32)
    h = jnp.maximum(h + b1_ref[...], 0.0)
    # Second linear on the lane-padded (128-wide) output tile.
    y = jnp.dot(h.astype(w2_ref.dtype), w2_ref[...],
                preferred_element_type=jnp.float32)
    o_ref[...] = y + b2_ref[...]


def prepare_params(w1_t, b1, w2_t, b2, *, compute_dtype=jnp.bfloat16):
    """Hoisted once-per-model prep: bias reshape, lane padding, bf16 casts.

    w1_t: (input_dim, 512)  -- transpose of PyTorch Linear weight (512, input_dim)
    w2_t: (512, output_dim) -- transpose of PyTorch Linear weight
    b1, b2: 1-D PyTorch-style or (1, dim).
    """
    in_dim, hid = w1_t.shape
    out_dim = w2_t.shape[1]
    out_pad = _round_up(out_dim, _LANE)

    b1 = jnp.asarray(b1, jnp.float32).reshape(1, hid)
    b2 = jnp.asarray(b2, jnp.float32).reshape(1, out_dim)
    if out_pad != out_dim:
        w2_t = jnp.pad(w2_t, ((0, 0), (0, out_pad - out_dim)))
        b2 = jnp.pad(b2, ((0, 0), (0, out_pad - out_dim)))

    return dict(
        w1=jnp.asarray(w1_t).astype(compute_dtype),
        b1=b1,
        w2=jnp.asarray(w2_t).astype(compute_dtype),
        b2=b2,
        out_dim=out_dim,
        compute_dtype=compute_dtype,
    )


def diversifying_mlp_forward(x, params, *, tile_b=None, vmem_limit_bytes=None):
    """x: (B, input_dim) in f32 or bf16; params from prepare_params()."""
    w1_c, b1_f = params["w1"], params["b1"]
    w2_c, b2_f = params["w2"], params["b2"]
    out_dim = params["out_dim"]
    compute_dtype = params["compute_dtype"]

    B, in_dim = x.shape
    assert w1_c.shape[0] == in_dim, "input_dim mismatch with prepared params"
    hid = w1_c.shape[1]
    out_pad = w2_c.shape[1]

    x_itemsize = jnp.dtype(x.dtype).itemsize
    weight_bytes = (w1_c.size * jnp.dtype(w1_c.dtype).itemsize
                    + w2_c.size * jnp.dtype(w2_c.dtype).itemsize
                    + b1_f.size * 4 + b2_f.size * 4)

    # --- batch tile: large, but aim for >= 2 grid steps (v7x dual-core) ---
    if tile_b is None:
        target = pl.cdiv(B, 2) if B > _SUBLANE else B
        tile_b = min(_MAX_TILE_B, _round_up(target, _SUBLANE))
        # Cap by per-step VMEM: x double-buffered at HBM dtype + f32 out
        # double-buffered; resident weights are single-buffered.
        per_row = in_dim * x_itemsize * 2 + out_pad * 4 * 2
        fit = (_VMEM_SOFT_BUDGET - weight_bytes) // per_row
        fit = max(_SUBLANE, (fit // _SUBLANE) * _SUBLANE)
        tile_b = max(_SUBLANE, min(tile_b, fit))
    else:
        tile_b = max(_SUBLANE, _round_up(tile_b, _SUBLANE))
    tile_b = min(tile_b, _round_up(B, _SUBLANE))

    num_blocks = pl.cdiv(B, tile_b)   # ragged tail handled by partial tiles

    # --- x pipeline depth: deepen only when it helps and fits VMEM ---
    x_tile_bytes = tile_b * in_dim * x_itemsize
    out_tile_bytes = tile_b * out_pad * 4
    if num_blocks == 1:
        x_buffers = 1
    elif (num_blocks >= 3 and
          weight_bytes + 3 * x_tile_bytes + 2 * out_tile_bytes
          <= _VMEM_SOFT_BUDGET):
        x_buffers = 3
    else:
        x_buffers = 2
    est_vmem = weight_bytes + x_buffers * x_tile_bytes + 2 * out_tile_bytes

    if vmem_limit_bytes is None and est_vmem > 12 * 1024 * 1024:
        # v5e scoped default is only 16 MiB; raise it, capped well under
        # v7x's 64 MiB physical VMEM.
        vmem_limit_bytes = int(min(_VMEM_LIMIT_CAP,
                                   max(32 * 1024 * 1024, 2 * est_vmem)))

    cost = pl.CostEstimate(
        flops=2 * B * (in_dim * hid + hid * out_pad),
        transcendentals=0,
        bytes_accessed=(x.size * x_itemsize + weight_bytes + B * out_pad * 4),
    )

    def _resident(shape):
        # Grid-invariant operand: fetched once, single-buffered to save VMEM.
        return pl.BlockSpec(shape, lambda i: (0, 0),
                            pipeline_mode=pl.Buffered(1))

    x_spec = pl.BlockSpec((tile_b, in_dim), lambda i: (i, 0),
                          pipeline_mode=pl.Buffered(x_buffers))

    out = pl.pallas_call(
        functools.partial(mlp_kernel, compute_dtype=compute_dtype),
        out_shape=jax.ShapeDtypeStruct((B, out_pad), jnp.float32),
        grid_spec=pltpu.PrefetchScalarGridSpec(
            num_scalar_prefetch=0,
            grid=(num_blocks,),
            in_specs=[
                x_spec,                      # x tile (cast to bf16 in-kernel)
                _resident(w1_c.shape),       # W1^T (bf16, resident)
                _resident(b1_f.shape),       # b1 (f32)
                _resident(w2_c.shape),       # W2^T (bf16, lane-padded)
                _resident(b2_f.shape),       # b2 (f32, lane-padded)
            ],
            out_specs=pl.BlockSpec((tile_b, out_pad), lambda i: (i, 0)),
        ),
        compiler_params=pltpu.CompilerParams(
            dimension_semantics=("parallel",),
            vmem_limit_bytes=vmem_limit_bytes,
        ),
        cost_estimate=cost,
    )(x, w1_c, b1_f, w2_c, b2_f)

    # Strip lane padding only; batch rows were never padded (partial tiles).
    return out[:, :out_dim] if out_pad != out_dim else out


def init_params(key, input_dim=2048, hidden_dim=512, output_dim=10):
    """Deterministic init mirroring the module's shapes.

    kaiming_normal_(mode='fan_out', relu) -> std = sqrt(2 / fan_out);
    biases use PyTorch Linear default U(-1/sqrt(fan_in), 1/sqrt(fan_in)).
    Weights are stored as the transpose (in, out) of the PyTorch (out, in).
    """
    k1, k2, k3, k4 = jax.random.split(key, 4)
    std1 = (2.0 / hidden_dim) ** 0.5
    std2 = (2.0 / output_dim) ** 0.5
    w1_t = std1 * jax.random.normal(k1, (input_dim, hidden_dim), jnp.float32)
    w2_t = std2 * jax.random.normal(k2, (hidden_dim, output_dim), jnp.float32)
    bound1 = 1.0 / (input_dim ** 0.5)
    bound2 = 1.0 / (hidden_dim ** 0.5)
    b1 = jax.random.uniform(k3, (hidden_dim,), jnp.float32, -bound1, bound1)
    b2 = jax.random.uniform(k4, (output_dim,), jnp.float32, -bound2, bound2)
    return w1_t, b1, w2_t, b2


if __name__ == "__main__":
    IN_DIM, HID, OUT_DIM = 256, 512, 10   # hidden fixed at 512 by the module

    key = jax.random.PRNGKey(0)
    kx, kp = jax.random.split(key)
    w1_t, b1, w2_t, b2 = init_params(kp, IN_DIM, HID, OUT_DIM)
    params = prepare_params(w1_t, b1, w2_t, b2)   # casts/pads hoisted once

    # Exercise: ragged single-tile batch (10) and ragged multi-step batch (40).
    for batch in (10, 40):
        kx, sub = jax.random.split(kx)
        x = jax.random.normal(sub, (batch, IN_DIM), jnp.float32)

        out = jax.block_until_ready(diversifying_mlp_forward(x, params))
        assert out.shape == (batch, OUT_DIM)

        # Reference mirroring the kernel's bf16-operand / f32-accumulate math.
        xb = x.astype(jnp.bfloat16).astype(jnp.float32)
        w1b = w1_t.astype(jnp.bfloat16).astype(jnp.float32)
        w2b = w2_t.astype(jnp.bfloat16).astype(jnp.float32)
        h_ref = jnp.maximum(xb @ w1b + b1[None, :], 0.0)
        h_ref = h_ref.astype(jnp.bfloat16).astype(jnp.float32)
        ref = h_ref @ w2b + b2[None, :]
        assert jnp.allclose(out, ref, atol=2e-2, rtol=2e-2), "bf16 ref mismatch"

        # Loose sanity check against the pure-f32 module math.
        ref32 = jnp.maximum(x @ w1_t + b1[None, :], 0.0) @ w2_t + b2[None, :]
        assert jnp.allclose(out, ref32, atol=0.5, rtol=5e-2), "f32 ref mismatch"

    print("KERNEL_OK")
</pallas_src>

<mosaic_0001>
module attributes {stable_mosaic.version = 11 : i64} {
  func.func @mlp_kernel(%arg0: i32, %arg1: memref<16x256xf32, #tpu.memory_space<vmem>>, %arg2: memref<256x512xbf16, #tpu.memory_space<vmem>>, %arg3: memref<1x512xf32, #tpu.memory_space<vmem>>, %arg4: memref<512x128xbf16, #tpu.memory_space<vmem>>, %arg5: memref<1x128xf32, #tpu.memory_space<vmem>>, %arg6: memref<16x128xf32, #tpu.memory_space<vmem>>) attributes {dimension_semantics = [#tpu.dimension_semantics<parallel>], iteration_bounds = array<i64: 1>, scalar_prefetch = 0 : i64, scratch_operands = 0 : i64, tpu.core_type = #tpu.core_type<tc>, window_params = [{pipeline_mode = #tpu.pipeline_mode<synchronous>, transform_indices = @transform_0, window_bounds = array<i64: 16, 256>}, {pipeline_mode = #tpu.pipeline_mode<synchronous>, transform_indices = @transform_1, window_bounds = array<i64: 256, 512>}, {pipeline_mode = #tpu.pipeline_mode<synchronous>, transform_indices = @transform_2, window_bounds = array<i64: 1, 512>}, {pipeline_mode = #tpu.pipeline_mode<synchronous>, transform_indices = @transform_3, window_bounds = array<i64: 512, 128>}, {pipeline_mode = #tpu.pipeline_mode<synchronous>, transform_indices = @transform_4, window_bounds = array<i64: 1, 128>}, {transform_indices = @transform_5, window_bounds = array<i64: 16, 128>}]} {
    %c0 = arith.constant 0 : index
    %c0_0 = arith.constant 0 : index
    %0 = vector.load %arg1[%c0, %c0_0] : memref<16x256xf32, #tpu.memory_space<vmem>>, vector<16x256xf32>
    %1 = arith.truncf %0 : vector<16x256xf32> to vector<16x256xbf16>
    %c0_1 = arith.constant 0 : index
    %c0_2 = arith.constant 0 : index
    %2 = vector.load %arg2[%c0_1, %c0_2] : memref<256x512xbf16, #tpu.memory_space<vmem>>, vector<256x512xbf16>
    %cst = arith.constant dense<0.000000e+00> : vector<16x512xf32>
    %3 = tpu.matmul %1, %2, %cst {dimension_numbers = #tpu.dot_dimension_numbers<[1], [0], [0], [1], [0, 0, 1, 1], [], []>} : vector<16x256xbf16>, vector<256x512xbf16>, vector<16x512xf32> -> vector<16x512xf32>
    %c0_3 = arith.constant 0 : index
    %c0_4 = arith.constant 0 : index
    %4 = vector.load %arg3[%c0_3, %c0_4] : memref<1x512xf32, #tpu.memory_space<vmem>>, vector<1x512xf32>
    %5 = vector.broadcast %4 : vector<1x512xf32> to vector<16x512xf32>
    %6 = arith.addf %3, %5 : vector<16x512xf32>
    %cst_5 = arith.constant 0.000000e+00 : f32
    %7 = vector.broadcast %cst_5 : f32 to vector<16x512xf32>
    %8 = arith.maximumf %6, %7 : vector<16x512xf32>
    %9 = arith.truncf %8 : vector<16x512xf32> to vector<16x512xbf16>
    %c0_6 = arith.constant 0 : index
    %c0_7 = arith.constant 0 : index
    %10 = vector.load %arg4[%c0_6, %c0_7] : memref<512x128xbf16, #tpu.memory_space<vmem>>, vector<512x128xbf16>
    %cst_8 = arith.constant dense<0.000000e+00> : vector<16x128xf32>
    %11 = tpu.matmul %9, %10, %cst_8 {dimension_numbers = #tpu.dot_dimension_numbers<[1], [0], [0], [1], [0, 0, 1, 1], [], []>} : vector<16x512xbf16>, vector<512x128xbf16>, vector<16x128xf32> -> vector<16x128xf32>
    %c0_9 = arith.constant 0 : index
    %c0_10 = arith.constant 0 : index
    %12 = vector.load %arg5[%c0_9, %c0_10] : memref<1x128xf32, #tpu.memory_space<vmem>>, vector<1x128xf32>
    %13 = vector.broadcast %12 : vector<1x128xf32> to vector<16x128xf32>
    %14 = arith.addf %11, %13 : vector<16x128xf32>
    %c0_11 = arith.constant 0 : index
    %c0_12 = arith.constant 0 : index
    %15 = vector.load %arg6[%c0_11, %c0_12] : memref<16x128xf32, #tpu.memory_space<vmem>>, vector<16x128xf32>
    tpu.vector_store %arg6[%c0_11, %c0_12], %14 {strides = array<i32>} : memref<16x128xf32, #tpu.memory_space<vmem>>, vector<16x128xf32>,
    return
  }
  func.func @transform_0(%arg0: i32) -> (i32, i32) {
    %c0_i32 = arith.constant 0 : i32
    %c0_i32_0 = arith.constant 0 : i32
    return %arg0, %c0_i32 : i32, i32
  }
  func.func @transform_1(%arg0: i32) -> (i32, i32) {
    %c0_i32 = arith.constant 0 : i32
    %c0_i32_0 = arith.constant 0 : i32
    %c0_i32_1 = arith.constant 0 : i32
    return %c0_i32, %c0_i32_0 : i32, i32
  }
  func.func @transform_2(%arg0: i32) -> (i32, i32) {
    %c0_i32 = arith.constant 0 : i32
    %c0_i32_0 = arith.constant 0 : i32
    %c0_i32_1 = arith.constant 0 : i32
    return %c0_i32, %c0_i32_0 : i32, i32
  }
  func.func @transform_3(%arg0: i32) -> (i32, i32) {
    %c0_i32 = arith.constant 0 : i32
    %c0_i32_0 = arith.constant 0 : i32
    %c0_i32_1 = arith.constant 0 : i32
    return %c0_i32, %c0_i32_0 : i32, i32
  }
  func.func @transform_4(%arg0: i32) -> (i32, i32) {
    %c0_i32 = arith.constant 0 : i32
    %c0_i32_0 = arith.constant 0 : i32
    %c0_i32_1 = arith.constant 0 : i32
    return %c0_i32, %c0_i32_0 : i32, i32
  }
  func.func @transform_5(%arg0: i32) -> (i32, i32) {
    %c0_i32 = arith.constant 0 : i32
    %c0_i32_0 = arith.constant 0 : i32
    return %arg0, %c0_i32 : i32, i32
  }
}

</mosaic_0001>

<bundles_post_ra>
// kernel: tpu_custom_call.1
= control target key start
LH: loop header
LB: loop body
LE: loop exit
PB: predicated region body
PF: predicated region fallthrough
CT: control target
= control target key end

     0   :  { %10 = vsyncpa [#allocation3], 0  ;;  %s1398_s0 = inlined_call_operand.hbm [shape: f32[10,256], index: 0, kind: input, shape index: {}]   ;;  %s1399_s1 = inlined_call_operand.hbm [shape: bf16[256,512], index: 1, kind: input, shape index: {}]   ;;  %s1400_s2 = inlined_call_operand.hbm [shape: f32[1,512], index: 2, kind: input, shape index: {}]   ;;  %s1401_s3 = inlined_call_operand.hbm [shape: bf16[512,128], index: 3, kind: input, shape index: {}]   ;;  %s1402_s4 = inlined_call_operand.vmem [shape: f32[1,128], index: 4, kind: input, shape index: {}]   ;;  %s1403_s5 = inlined_call_operand.hbm [shape: f32[10,128], index: 5, kind: output, shape index: {}]  }
   0x1   :  { %11 = vsyncpa [#allocation6], 0 }
   0x2   :  { %12 = vsyncpa [#allocation9], 0 }
   0x3   :  { %13 = vsyncpa [#allocation4], 0  ;;  %s1339_s18 = smov [#allocation5]   ;;  %s1340_s20 = smov [#allocation2]  }
   0x4   :  { %s31_s19 = sshll.u32 %s1339_s18, 4  ;;  %s19_s21 = sshll.u32 %s1340_s20, 4  ;;  %s32_s19 = int_to_ptr.vmem [resolvable:$true] %s31_s19  ;;  %s20_s21 = int_to_ptr.vmem [resolvable:$true] %s19_s21 }
   0x5   :  { %s1239_s22 = scalar_lea.vmem %s32_s19, 8192  ;;  %p1244_p1 = scmp.lt.s32.totalorder %s32_s19, %s32_s19 }
   0x6   :  { %p1240_p0 = scmp.ne.s32.totalorder %s32_s19, %s1239_s22  ;;  %p1245_p2 = scmp.lt.s32.totalorder %s1239_s22, %s1239_s22 }
   0x8   :  { %p1246_p3 = por %p1245_p2, %p1244_p1 }
   0xa   :  { %p1247_p4 = pnand %p1246_p3, %p1240_p0 }
   0xc   :  { %1250 = shalt.err (!%p1247_p4)
}
   0xd   :  { %s1341_s23 = smov 256   ;;  %s1342_s24 = smov 16  }
   0xe   :  { %37 = dma.hbm_to_vmem [thread:$0]  %s1399_s1, 8192, %s32_s19, [#allocation6], %s1341_s23, %s1341_s23, %s1342_s24  }
   0xf   :  { %s1259_s27 = scalar_lea.vmem %s20_s21, 512  ;;  %p1264_p6 = scmp.lt.s32.totalorder %s20_s21, %s20_s21 }
  0x10   :  { %p1260_p5 = scmp.ne.s32.totalorder %s20_s21, %s1259_s27  ;;  %p1265_p7 = scmp.lt.s32.totalorder %s1259_s27, %s1259_s27 }
  0x12   :  { %p1266_p8 = por %p1265_p7, %p1264_p6 }
  0x14   :  { %p1267_p9 = pnand %p1266_p8, %p1260_p5 }
  0x16   :  { %1270 = shalt.err (!%p1267_p9)
}
  0x17   :  { %25 = dma.hbm_to_vmem [thread:$0]  %s1398_s0, 512, %s20_s21, [#allocation3], %s1341_s23, %s1341_s23, %s1342_s24  }
  0x18   :  { %s1343_s30 = smov [#allocation7]   ;;  %s1344_s7 = smov [#allocation8]  }
  0x19   :  { %s44_s6 = sshll.u32 %s1343_s30, 4  ;;  %s53_s8 = sshll.u32 %s1344_s7, 4  ;;  %s45_s6 = int_to_ptr.vmem [resolvable:$true] %s44_s6  ;;  %s54_s8 = int_to_ptr.vmem [resolvable:$true] %s53_s8 }
  0x1a   :  { %s1279_s9 = scalar_lea.vmem %s45_s6, 64  ;;  %p1284_p11 = scmp.lt.s32.totalorder %s45_s6, %s45_s6 }
  0x1b   :  { %p1280_p10 = scmp.ne.s32.totalorder %s45_s6, %s1279_s9  ;;  %p1285_p12 = scmp.lt.s32.totalorder %s1279_s9, %s1279_s9 }
  0x1d   :  { %p1286_p13 = por %p1285_p12, %p1284_p11 }
  0x1f   :  { %p1287_p0 = pnand %p1286_p13, %p1280_p10 }
  0x21   :  { %1290 = shalt.err (!%p1287_p0)
}
  0x22   :  { %47 = dma.hbm_to_vmem [thread:$0]  %s1400_s2, 64, %s45_s6, [#allocation6]  }
  0x23   :  { %s1299_s11 = scalar_lea.vmem %s54_s8, 4096  ;;  %p1304_p2 = scmp.lt.s32.totalorder %s54_s8, %s54_s8 }
  0x24   :  { %p1300_p1 = scmp.ne.s32.totalorder %s54_s8, %s1299_s11  ;;  %p1305_p3 = scmp.lt.s32.totalorder %s1299_s11, %s1299_s11 }
  0x26   :  { %p1306_p4 = por %p1305_p3, %p1304_p2 }
  0x28   :  { %p1307_p5 = pnand %p1306_p4, %p1300_p1 }
  0x2a   :  { %1310 = shalt.err (!%p1307_p5)
}
  0x2b   :  { %s1345_s0 = smov 64   ;;  %s1346_s12 = smov 4  }
  0x2c   :  { %59 = dma.hbm_to_vmem [thread:$0]  %s1401_s3, 4096, %s54_s8, [#allocation9], %s1345_s0, %s1345_s0, %s1346_s12  }
  0x2d   :  { %1331 = dma.done.wait [#allocation3], 512  }
  0x2e   :  { %1332 = vsyncadd [#allocation3], 4294966784 }
  0x2f   :  { %1333 = dma.done.wait [#allocation6], 8256  }
  0x30   :  { %1334 = vsyncadd [#allocation6], 4294959040 }
  0x31   :  { %1335 = dma.done.wait [#allocation9], 4096  }
  0x32   :  { %1336 = vsyncadd [#allocation9], 4294963200  ;;  %v1103_v0 = vld [vmem:[#allocation5 + $0xe4] ss:$16 sps:$4 sm:$0xff]   ;;  %v1105_v1 = vld [vmem:[#allocation5 + $0xec] ss:$16 sps:$4 sm:$0xff]  }
  0x33   :  { %487 = vmatprep.subr.bf16.mxu0 %v1103_v0  ;;  %v1107_v2 = vld [vmem:[#allocation5 + $0xe0] ss:$16 sps:$4 sm:$0xff]   ;;  %v1108_v3 = vld [vmem:[#allocation5 + $0xe8] ss:$16 sps:$4 sm:$0xff]   ;;  %530 = vmatprep.subr.bf16.mxu1 %v1105_v1  ;;  %v1109_v4 = vld [vmem:[#allocation5 + $0xc4] ss:$16 sps:$4 sm:$0xff]  }
  0x34   :  { %488 = vmatpush1.bf16.msra.mxu0 %v1107_v2  ;;  %531 = vmatpush1.bf16.msra.mxu1 %v1108_v3  ;;  %v1111_v5 = vld [vmem:[#allocation5 + $0xcc] ss:$16 sps:$4 sm:$0xff]   ;;  %v1113_v6 = vld [vmem:[#allocation5 + $0xc0] ss:$16 sps:$4 sm:$0xff]   ;;  %v1114_v7 = vld [vmem:[#allocation5 + $0xc8] ss:$16 sps:$4 sm:$0xff]  }
  0x35   :  { %489 = vmatprep.subr.bf16.mxu0 %v1109_v4  ;;  %532 = vmatprep.subr.bf16.mxu1 %v1111_v5  ;;  %v1115_v8 = vld [vmem:[#allocation5 + $0xa4] ss:$16 sps:$4 sm:$0xff]   ;;  %v1117_v9 = vld [vmem:[#allocation5 + $0xac] ss:$16 sps:$4 sm:$0xff]   ;;  %v1119_v10 = vld [vmem:[#allocation5 + $0xa0] ss:$16 sps:$4 sm:$0xff]  }
  0x36   :  { %v1120_v11 = vld [vmem:[#allocation5 + $0xa8] ss:$16 sps:$4 sm:$0xff]   ;;  %v1121_v12 = vld [vmem:[#allocation5 + $0x84] ss:$16 sps:$4 sm:$0xff]   ;;  %v1123_v13 = vld [vmem:[#allocation5 + $0x8c] ss:$16 sps:$4 sm:$0xff]  }
  0x37   :  { %v1125_v14 = vld [vmem:[#allocation5 + $0x80] ss:$16 sps:$4 sm:$0xff]   ;;  %v1126_v15 = vld [vmem:[#allocation5 + $0x88] ss:$16 sps:$4 sm:$0xff]   ;;  %v1127_v16 = vld [vmem:[#allocation5 + $0x64] ss:$16 sps:$4 sm:$0xff]  }
  0x38   :  { %490 = vmatpush1.bf16.msra.mxu0 %v1113_v6  ;;  %533 = vmatpush1.bf16.msra.mxu1 %v1114_v7  ;;  %v1129_v17 = vld [vmem:[#allocation5 + $0x6c] ss:$16 sps:$4 sm:$0xff]   ;;  %v1131_v18 = vld [vmem:[#allocation5 + $0x60] ss:$16 sps:$4 sm:$0xff]   ;;  %v1132_v19 = vld [vmem:[#allocation5 + $0x68] ss:$16 sps:$4 sm:$0xff]  }
  0x39   :  { %491 = vmatprep.subr.bf16.mxu0 %v1115_v8  ;;  %534 = vmatprep.subr.bf16.mxu1 %v1117_v9  ;;  %v1133_v20 = vld [vmem:[#allocation5 + $0x44] ss:$16 sps:$4 sm:$0xff]   ;;  %v1135_v21 = vld [vmem:[#allocation5 + $0x4c] ss:$16 sps:$4 sm:$0xff]   ;;  %v1137_v22 = vld [vmem:[#allocation5 + $0x40] ss:$16 sps:$4 sm:$0xff]  }
  0x3a   :  { %v1138_v23 = vld [vmem:[#allocation5 + $0x48] ss:$16 sps:$4 sm:$0xff]   ;;  %v1139_v24 = vld [vmem:[#allocation5 + $0x24] ss:$16 sps:$4 sm:$0xff]   ;;  %v1141_v25 = vld [vmem:[#allocation5 + $0x2c] ss:$16 sps:$4 sm:$0xff]  }
  0x3b   :  { %v1143_v26 = vld [vmem:[#allocation5 + $0x20] ss:$16 sps:$4 sm:$0xff]   ;;  %v1144_v27 = vld [vmem:[#allocation5 + $0x28] ss:$16 sps:$4 sm:$0xff]   ;;  %v1145_v28 = vld [vmem:[#allocation5 + $0x4] ss:$16 sps:$4 sm:$0xff]  }
  0x3c   :  { %492 = vmatpush1.bf16.msra.mxu0 %v1119_v10  ;;  %535 = vmatpush1.bf16.msra.mxu1 %v1120_v11  ;;  %v1147_v29 = vld [vmem:[#allocation5 + $0xc] ss:$16 sps:$4 sm:$0xff]   ;;  %v1149_v30 = vld [vmem:[#allocation5] ss:$16 sps:$4 sm:$0xff]   ;;  %v1150_v31 = vld [vmem:[#allocation5 + $0x8] ss:$16 sps:$4 sm:$0xff]  }
  0x3d   :  { %493 = vmatprep.subr.bf16.mxu0 %v1121_v12  ;;  %536 = vmatprep.subr.bf16.mxu1 %v1123_v13  ;;  %v1151_v32 = vld [vmem:[#allocation5 + $0x1e4] ss:$16 sps:$4 sm:$0xff]   ;;  %v1153_v33 = vld [vmem:[#allocation5 + $0x1ec] ss:$16 sps:$4 sm:$0xff]   ;;  %v1155_v34 = vld [vmem:[#allocation5 + $0x1e0] ss:$16 sps:$4 sm:$0xff]  }
  0x3e   :  { %v1156_v35 = vld [vmem:[#allocation5 + $0x1e8] ss:$16 sps:$4 sm:$0xff]   ;;  %v1157_v36 = vld [vmem:[#allocation5 + $0x1c4] ss:$16 sps:$4 sm:$0xff]   ;;  %v1159_v37 = vld [vmem:[#allocation5 + $0x1cc] ss:$16 sps:$4 sm:$0xff]  }
  0x3f   :  { %v1161_v38 = vld [vmem:[#allocation5 + $0x1c0] ss:$16 sps:$4 sm:$0xff]   ;;  %v1162_v39 = vld [vmem:[#allocation5 + $0x1c8] ss:$16 sps:$4 sm:$0xff]   ;;  %v1163_v40 = vld [vmem:[#allocation5 + $0x1a4] ss:$16 sps:$4 sm:$0xff]  }
  0x40   :  { %494 = vmatpush1.bf16.msra.mxu0 %v1125_v14  ;;  %537 = vmatpush1.bf16.msra.mxu1 %v1126_v15  ;;  %v1165_v41 = vld [vmem:[#allocation5 + $0x1ac] ss:$16 sps:$4 sm:$0xff]   ;;  %v1167_v42 = vld [vmem:[#allocation5 + $0x1a0] ss:$16 sps:$4 sm:$0xff]   ;;  %v1168_v43 = vld [vmem:[#allocation5 + $0x1a8] ss:$16 sps:$4 sm:$0xff]  }
  0x41   :  { %495 = vmatprep.subr.bf16.mxu0 %v1127_v16  ;;  %538 = vmatprep.subr.bf16.mxu1 %v1129_v17  ;;  %v1169_v44 = vld [vmem:[#allocation5 + $0x184] ss:$16 sps:$4 sm:$0xff]   ;;  %v1171_v45 = vld [vmem:[#allocation5 + $0x18c] ss:$16 sps:$4 sm:$0xff]   ;;  %v1173_v47 = vld [vmem:[#allocation5 + $0x180] ss:$16 sps:$4 sm:$0xff]  }
  0x42   :  { %v76_v46 = vld [vmem:[#allocation2 + $0x8] sm:$0xff]  ;;  %v78_v49 = vld [vmem:[#allocation2 + $0x18] sm:$0xff]  ;;  %v1175_v50 = vld [vmem:[#allocation5 + $0x164] ss:$16 sps:$4 sm:$0xff]   ;;  %s1347_s15 = smov [#allocation10]  }
  0x43   :  { %v1174_v48 = vld [vmem:[#allocation5 + $0x188] ss:$16 sps:$4 sm:$0xff]   ;;  %v80_v51 = vpack.c.bf16 %v78_v49, %v76_v46  ;;  %v1177_v52 = vld [vmem:[#allocation5 + $0x16c] ss:$16 sps:$4 sm:$0xff]   ;;  %v1179_v53 = vld [vmem:[#allocation5 + $0x160] ss:$16 sps:$4 sm:$0xff]  }
  0x44   :  { %496 = vmatpush1.bf16.msra.mxu0 %v1131_v18  ;;  %539 = vmatpush1.bf16.msra.mxu1 %v1132_v19  ;;  %v1180_v54 = vld [vmem:[#allocation5 + $0x168] ss:$16 sps:$4 sm:$0xff]   ;;  %v1181_v55 = vld [vmem:[#allocation5 + $0x144] ss:$16 sps:$4 sm:$0xff]   ;;  %v1183_v56 = vld [vmem:[#allocation5 + $0x14c] ss:$16 sps:$4 sm:$0xff]  }
  0x45   :  { %497 = vmatprep.subr.bf16.mxu0 %v1133_v20  ;;  %540 = vmatprep.subr.bf16.mxu1 %v1135_v21  ;;  %v1185_v57 = vld [vmem:[#allocation5 + $0x140] ss:$16 sps:$4 sm:$0xff]   ;;  %v1186_v58 = vld [vmem:[#allocation5 + $0x148] ss:$16 sps:$4 sm:$0xff]   ;;  %v1187_v59 = vld [vmem:[#allocation5 + $0x124] ss:$16 sps:$4 sm:$0xff]  }
  0x46   :  { %519 = vmatprep.mubr.bf16.mxu0 %v80_v51  ;;  %562 = vmatprep.mubr.bf16.mxu1 %v80_v51  ;;  %v1189_v60 = vld [vmem:[#allocation5 + $0x12c] ss:$16 sps:$4 sm:$0xff]   ;;  %v1191_v61 = vld [vmem:[#allocation5 + $0x120] ss:$16 sps:$4 sm:$0xff]   ;;  %v1192_v62 = vld [vmem:[#allocation5 + $0x128] ss:$16 sps:$4 sm:$0xff]  }
  0x47   :  { %v1193_v63 = vld [vmem:[#allocation5 + $0x104] ss:$16 sps:$4 sm:$0xff]   ;;  %v1195_v0 = vld [vmem:[#allocation5 + $0x10c] ss:$16 sps:$4 sm:$0xff]   ;;  %v1197_v1 = vld [vmem:[#allocation5 + $0x100] ss:$16 sps:$4 sm:$0xff]  }
  0x48   :  { %498 = vmatpush1.bf16.msra.mxu0 %v1137_v22  ;;  %541 = vmatpush1.bf16.msra.mxu1 %v1138_v23  ;;  %v1198_v2 = vld [vmem:[#allocation5 + $0x108] ss:$16 sps:$4 sm:$0xff]   ;;  %v75_v3 = vld [vmem:[#allocation2] sm:$0xff]  ;;  %v77_v4 = vld [vmem:[#allocation2 + $0x10] sm:$0xff]  ;;  %s937_s16 = sshll.u32 %s1347_s15, 4  ;;  %s938_s16 = int_to_ptr.vmem [resolvable:$true] %s937_s16 }
  0x49   :  { %499 = vmatprep.subr.bf16.mxu0 %v1139_v24  ;;  %542 = vmatprep.subr.bf16.mxu1 %v1141_v25  ;;  %v1199_v5 = vld [vmem:[#allocation8 + $0x78] sm:$0xff]   ;;  %v79_v9 = vpack.c.bf16 %v77_v4, %v75_v3  ;;  %v1203_v10 = vld [vmem:[#allocation8 + $0x70] sm:$0xff]   ;;  %v1207_v14 = vld [vmem:[#allocation8 + $0x68] sm:$0xff]   ;;  %p1316_p7 = scmp.lt.s32.totalorder %s938_s16, %s938_s16 }
  0x4a   :  { %v1200_v6 = vld [vmem:[#allocation8 + $0xf8] sm:$0xff]   ;;  %v1204_v11 = vld [vmem:[#allocation8 + $0xf0] sm:$0xff]   ;;  %v1208_v15 = vld [vmem:[#allocation8 + $0xe8] sm:$0xff]  }
  0x4b   :  { %v1201_v7 = vld [vmem:[#allocation8 + $0x38] sm:$0xff]   ;;  %v1205_v12 = vld [vmem:[#allocation8 + $0x30] sm:$0xff]   ;;  %v1209_v16 = vld [vmem:[#allocation8 + $0x28] sm:$0xff]  }
  0x4c   :  { %500 = vmatpush1.bf16.msra.mxu0 %v1143_v26  ;;  %543 = vmatpush1.bf16.msra.mxu1 %v1144_v27  ;;  %v1202_v8 = vld [vmem:[#allocation8 + $0xb8] sm:$0xff]   ;;  %v1206_v13 = vld [vmem:[#allocation8 + $0xb0] sm:$0xff]   ;;  %v1210_v17 = vld [vmem:[#allocation8 + $0xa8] sm:$0xff]  }
  0x4d   :  { %501 = vmatprep.subr.bf16.mxu0 %v1145_v28  ;;  %544 = vmatprep.subr.bf16.mxu1 %v1147_v29  ;;  %v1211_v18 = vld [vmem:[#allocation8 + $0x60] sm:$0xff]   ;;  %v1215_v22 = vld [vmem:[#allocation8 + $0x58] sm:$0xff]   ;;  %v1219_v26 = vld [vmem:[#allocation8 + $0x50] sm:$0xff]  }
  0x4e   :  { %v1212_v19 = vld [vmem:[#allocation8 + $0xe0] sm:$0xff]   ;;  %v1216_v23 = vld [vmem:[#allocation8 + $0xd8] sm:$0xff]   ;;  %v1220_v27 = vld [vmem:[#allocation8 + $0xd0] sm:$0xff]  }
  0x4f   :  { %v1213_v20 = vld [vmem:[#allocation8 + $0x20] sm:$0xff]   ;;  %v1217_v24 = vld [vmem:[#allocation8 + $0x18] sm:$0xff]   ;;  %v1221_v28 = vld [vmem:[#allocation8 + $0x10] sm:$0xff]  }
  0x50   :  { %502 = vmatpush1.bf16.msra.mxu0 %v1149_v30  ;;  %545 = vmatpush1.bf16.msra.mxu1 %v1150_v31  ;;  %v1214_v21 = vld [vmem:[#allocation8 + $0xa0] sm:$0xff]   ;;  %v1218_v25 = vld [vmem:[#allocation8 + $0x98] sm:$0xff]   ;;  %v1222_v29 = vld [vmem:[#allocation8 + $0x90] sm:$0xff]  }
  0x51   :  { %503 = vmatprep.subr.bf16.mxu0 %v1151_v32  ;;  %546 = vmatprep.subr.bf16.mxu1 %v1153_v33  ;;  %v1223_v30 = vld [vmem:[#allocation8 + $0x48] sm:$0xff]  }
  0x52   :  { %v1224_v31 = vld [vmem:[#allocation8 + $0xc8] sm:$0xff]  }
  0x53   :  { %v1225_v32 = vld [vmem:[#allocation8 + $0x8] sm:$0xff]  }
  0x54   :  { %504 = vmatpush2.bf16.msra.mxu0 %v1155_v34  ;;  %547 = vmatpush2.bf16.msra.mxu1 %v1156_v35  ;;  %v1226_v33 = vld [vmem:[#allocation8 + $0x88] sm:$0xff]   ;;  %v1227_v34 = vld [vmem:[#allocation8 + $0x40] sm:$0xff]  }
  0x55   :  { %505 = vmatprep.subr.bf16.mxu0 %v1157_v36  ;;  %548 = vmatprep.subr.bf16.mxu1 %v1159_v37  ;;  %v1228_v35 = vld [vmem:[#allocation8 + $0xc0] sm:$0xff]  }
  0x56   :  { %v1229_v36 = vld [vmem:[#allocation8] sm:$0xff]  }
  0x57   :  { %v1230_v37 = vld [vmem:[#allocation8 + $0x80] sm:$0xff]  }
  0x58   :  { %506 = vmatpush2.bf16.msra.mxu0 %v1161_v38  ;;  %549 = vmatpush2.bf16.msra.mxu1 %v1162_v39  ;;  %v147_v38 = vlaneseq }
  0x59   :  { %507 = vmatprep.subr.bf16.mxu0 %v1163_v40  ;;  %550 = vmatprep.subr.bf16.mxu1 %v1165_v41 }
  0x5a   :  { %v148_v39 = vshrl.u32 %v147_v38, 7 }
  0x5c   :  { %508 = vmatpush2.bf16.msra.mxu0 %v1167_v42  ;;  %551 = vmatpush2.bf16.msra.mxu1 %v1168_v43  ;;  %v153_v40 = vsub.s32 1, %v148_v39  ;;  %v161_v41 = vsub.s32 3, %v148_v39  ;;  %v149_v42 = vsub.s32 0, %v148_v39  ;;  %v157_v43 = vsub.s32 2, %v148_v39 }
  0x5d   :  { %509 = vmatprep.subr.bf16.mxu0 %v1169_v44  ;;  %552 = vmatprep.subr.bf16.mxu1 %v1171_v45  ;;  %v145_v44 = vld [vmem:[#allocation7] sm:$0xf] }
  0x5e   :  { %v150_v49 = vrot.slane %v145_v44, %v149_v42 }
  0x60   :  { %510 = vmatpush2.bf16.msra.mxu0 %v1173_v47  ;;  %553 = vmatpush2.bf16.msra.mxu1 %v1174_v48  ;;  %v154_v47 = vrot.slane %v145_v44, %v153_v40  ;;  %v162_v48 = vrot.slane %v145_v44, %v161_v41 }
  0x61   :  { %511 = vmatprep.subr.bf16.mxu0 %v1175_v50  ;;  %554 = vmatprep.subr.bf16.mxu1 %v1177_v52  ;;  %v158_v50 = vrot.slane %v145_v44, %v157_v43 }
  0x64   :  { %512 = vmatpush2.bf16.msra.mxu0 %v1179_v53  ;;  %555 = vmatpush2.bf16.msra.mxu1 %v1180_v54 }
  0x65   :  { %513 = vmatprep.subr.bf16.mxu0 %v1181_v55  ;;  %556 = vmatprep.subr.bf16.mxu1 %v1183_v56 }
  0x68   :  { %514 = vmatpush2.bf16.msra.mxu0 %v1185_v57  ;;  %557 = vmatpush2.bf16.msra.mxu1 %v1186_v58 }
  0x69   :  { %515 = vmatprep.subr.bf16.mxu0 %v1187_v59  ;;  %558 = vmatprep.subr.bf16.mxu1 %v1189_v60 }
  0x6c   :  { %516 = vmatpush2.bf16.msra.mxu0 %v1191_v61  ;;  %559 = vmatpush2.bf16.msra.mxu1 %v1192_v62 }
  0x6d   :  { %517 = vmatprep.subr.bf16.mxu0 %v1193_v63  ;;  %560 = vmatprep.subr.bf16.mxu1 %v1195_v0 }
  0x70   :  { %518 = vmatpush2.bf16.msra.mxu0 %v1197_v1  ;;  %561 = vmatpush2.bf16.msra.mxu1 %v1198_v2 }
  0x71   :  { %1048 = vmatprep.subr.bf16.mxu0 %v1199_v5  ;;  %1070 = vmatprep.subr.bf16.mxu1 %v1200_v6 }
  0x73   :  { %520 = vmatmul.mubr.bf16.vlgmr.msra.gmra.mxu0 %v79_v9  ;;  %563 = vmatmul.mubr.bf16.vlgmr.msra.gmra.mxu1 %v79_v9 }
  0x74   :  { %1049 = vmatpush3.bf16.msra.mxu0 %v1201_v7  ;;  %1071 = vmatpush3.bf16.msra.mxu1 %v1202_v8 }
  0x75   :  { %1050 = vmatprep.subr.bf16.mxu0 %v1203_v10  ;;  %1072 = vmatprep.subr.bf16.mxu1 %v1204_v11 }
  0x78   :  { %1051 = vmatpush3.bf16.msra.mxu0 %v1205_v12  ;;  %1073 = vmatpush3.bf16.msra.mxu1 %v1206_v13 }
  0x79   :  { %1052 = vmatprep.subr.bf16.mxu0 %v1207_v14  ;;  %1074 = vmatprep.subr.bf16.mxu1 %v1208_v15  ;;  %v1015_v15 = vld [vmem:[%s1402_s4] ss:$0 sm:$0xff]  ;;  %s1311_s4 = scalar_lea.vmem %s938_s16, 256 }
  0x7a   :  { %p1312_p6 = scmp.ne.s32.totalorder %s938_s16, %s1311_s4  ;;  %p1317_p8 = scmp.lt.s32.totalorder %s1311_s4, %s1311_s4 }
  0x7c   :  { %1053 = vmatpush3.bf16.msra.mxu0 %v1209_v16  ;;  %1075 = vmatpush3.bf16.msra.mxu1 %v1210_v17  ;;  %p1318_p9 = por %p1317_p8, %p1316_p7 }
  0x7d   :  { %1054 = vmatprep.subr.bf16.mxu0 %v1211_v18  ;;  %1076 = vmatprep.subr.bf16.mxu1 %v1212_v19 }
  0x7e   :  { %p1319_p10 = pnand %p1318_p9, %p1312_p6 }
  0x80   :  { %1055 = vmatpush3.bf16.msra.mxu0 %v1213_v20  ;;  %1077 = vmatpush3.bf16.msra.mxu1 %v1214_v21 }
  0x81   :  { %1056 = vmatprep.subr.bf16.mxu0 %v1215_v22  ;;  %1078 = vmatprep.subr.bf16.mxu1 %v1216_v23 }
  0x84   :  { %1057 = vmatpush3.bf16.msra.mxu0 %v1217_v24  ;;  %1079 = vmatpush3.bf16.msra.mxu1 %v1218_v25 }
  0x85   :  { %1058 = vmatprep.subr.bf16.mxu0 %v1219_v26  ;;  %1080 = vmatprep.subr.bf16.mxu1 %v1220_v27 }
  0x88   :  { %1059 = vmatpush3.bf16.msra.mxu0 %v1221_v28  ;;  %1081 = vmatpush3.bf16.msra.mxu1 %v1222_v29 }
  0x89   :  { %1060 = vmatprep.subr.bf16.mxu0 %v1223_v30  ;;  %1082 = vmatprep.subr.bf16.mxu1 %v1224_v31 }
  0x8c   :  { %1061 = vmatpush3.bf16.msra.mxu0 %v1225_v32  ;;  %1083 = vmatpush3.bf16.msra.mxu1 %v1226_v33 }
  0x8d   :  { %1062 = vmatprep.subr.bf16.mxu0 %v1227_v34  ;;  %1084 = vmatprep.subr.bf16.mxu1 %v1228_v35 }
  0x90   :  { %1063 = vmatpush3.bf16.msra.mxu0 %v1229_v36  ;;  %1085 = vmatpush3.bf16.msra.mxu1 %v1230_v37 }
 0x133   :  { %v521_v45 = vpop.f32.mrf.mxu0  ;;  %v564_v46 = vpop.f32.mrf.mxu1 }
 0x134   :  { %v522_v59 = vadd.f32 %v521_v45, %v150_v49  ;;  %v565_v60 = vadd.f32 %v564_v46, %v158_v50 }
 0x135   :  { %v523_v51 = vpop.f32.mrf.mxu0  ;;  %v566_v52 = vpop.f32.mrf.mxu1 }
 0x136   :  { %v524_v55 = vadd.f32 %v523_v51, %v154_v47  ;;  %v567_v56 = vadd.f32 %v566_v52, %v162_v48  ;;  %v573_v7 = vmax.f32 %v522_v59, 0.0  ;;  %v575_v8 = vmax.f32 %v565_v60, 0.0 }
 0x137   :  { %v525_v53 = vpop.f32.mrf.mxu0  ;;  %v568_v54 = vpop.f32.mrf.mxu1 }
 0x138   :  { %v526_v57 = vadd.f32 %v525_v53, %v150_v49  ;;  %v569_v58 = vadd.f32 %v568_v54, %v158_v50  ;;  %v574_v3 = vmax.f32 %v524_v55, 0.0  ;;  %v576_v4 = vmax.f32 %v567_v56, 0.0 }
 0x139   :  { %v527_v61 = vpop.f32.mrf.mxu0  ;;  %v570_v62 = vpop.f32.mrf.mxu1 }
 0x13a   :  { %v528_v63 = vadd.f32 %v527_v61, %v154_v47  ;;  %v571_v0 = vadd.f32 %v570_v62, %v162_v48  ;;  %v577_v1 = vmax.f32 %v526_v57, 0.0  ;;  %v579_v2 = vmax.f32 %v569_v58, 0.0 }
 0x13c   :  { %v578_v5 = vmax.f32 %v528_v63, 0.0  ;;  %v580_v6 = vmax.f32 %v571_v0, 0.0  ;;  %v581_v11 = vpack.c.bf16 %v577_v1, %v573_v7  ;;  %v583_v12 = vpack.c.bf16 %v579_v2, %v575_v8 }
 0x13e   :  { %v582_v9 = vpack.c.bf16 %v578_v5, %v574_v3  ;;  %v584_v10 = vpack.c.bf16 %v580_v6, %v576_v4 }
 0x140   :  { %880 = vmatprep.mubr.bf16.mxu0 %v582_v9  ;;  %921 = vmatprep.mubr.bf16.mxu1 %v584_v10 }
 0x141   :  { %881 = vmatmul.mubr.bf16.vlgmr.msra.gmra.mxu0 %v581_v11  ;;  %922 = vmatmul.mubr.bf16.vlgmr.msra.gmra.mxu1 %v583_v12 }
 0x201   :  { %v1064_v13 = vpop.f32.mrf.mxu0  ;;  %v1086_v14 = vpop.f32.mrf.mxu1 }
 0x203   :  { %v1065_v16 = vpop.f32.mrf.mxu0  ;;  %v1087_v17 = vpop.f32.mrf.mxu1 }
 0x204   :  { %v1066_v18 = vadd.f32 %v1065_v16, %v1064_v13  ;;  %v1088_v22 = vadd.f32 %v1087_v17, %v1086_v14 }
 0x205   :  { %v1067_v19 = vpop.f32.mrf.mxu0  ;;  %v1089_v20 = vpop.f32.mrf.mxu1 }
 0x206   :  { %v883_v21 = vadd.f32 %v1066_v18, %v1015_v15 }
 0x207   :  { %v1068_v23 = vpop.f32.mrf.mxu0  ;;  %v1090_v24 = vpop.f32.mrf.mxu1 }
 0x208   :  { %v924_v25 = vadd.f32 %v1088_v22, %v883_v21  ;;  %v1069_v26 = vadd.f32 %v1068_v23, %v1067_v19  ;;  %v1091_v28 = vadd.f32 %v1090_v24, %v1089_v20 }
 0x20a   :  { %930 = vst [vmem:[#allocation10] sm:$0xff] %v924_v25  ;;  %v886_v27 = vadd.f32 %v1069_v26, %v1015_v15 }
 0x20c   :  { %v927_v29 = vadd.f32 %v1091_v28, %v886_v27 }
 0x20e   :  { %931 = vst [vmem:[#allocation10 + $0x8] sm:$0xff] %v927_v29 }
 0x20f   :  { %1322 = shalt.err (!%p1319_p10)
}
 0x210   :  { %s1348_s17 = smov 128   ;;  %s1349_s18 = smov 8  }
 0x211   :  { %943 = dma.vmem_to_hbm [thread:$0]  %s938_s16, 256, %s1403_s5, [#allocation4], %s1348_s17, %s1348_s17, %s1349_s18  }
 0x212   :  { %1337 = dma.done.wait [#allocation4], 256  }
 0x213   :  { %1338 = vsyncadd [#allocation4], 4294967040 }
 0x214   :  { %947 = vsyncpa [#allocation3], 1 }
 0x215   :  { %948 = vsyncpa [#allocation6], 1 }
 0x216   :  { %949 = vsyncpa [#allocation9], 1 }
 0x217   :  { %950 = vsyncpa [#allocation4], 1 }

</bundles_post_ra>
